<compile_context>
chip_gen: v7x
topology: tpu7x:2x2x1
jax: 0.10.0
libtpu: 0.0.40
codegen_flags: <defaults>
</compile_context>

<pallas_src>
import math

import jax
import jax.numpy as jnp
from jax.experimental import pallas as pl
from jax.experimental.pallas import tpu as pltpu

_COMPUTE_DTYPE = jnp.bfloat16   # MXU-native dot inputs; f32 accumulation everywhere.
_WEIGHT_DTYPE = jnp.bfloat16    # weights stored in bf16 in HBM/VMEM (halves traffic).


def _round_up(v, m):
    return ((v + m - 1) // m) * m


def _cdiv(a, b):
    return -(-a // b)


# ---------------------------------------------------------------------------
# Host-side parameter preparation (done ONCE via prepare_fairnn; cacheable)
# ---------------------------------------------------------------------------
def fold_nn_params(params, *, pad_to=None, weight_dtype=_WEIGHT_DTYPE):
    """Fold (x - mean)/std into the first layer (+ residual head), zero-pad the hidden
    width to an MXU-friendly multiple, and cast weights to `weight_dtype`.
    Biases stay f32 (bias-add / ReLU run in f32 inside the kernel)."""
    mean, std = params["mean"], params["std"]
    # NOTE: 1/std with no epsilon on purpose -- matches torch's (x - mean)/std
    # semantics exactly (std == 0 produces inf/NaN there as well).
    inv_std = 1.0 / std
    shift = -mean * inv_std                       # x_std = x * inv_std + shift
    layers, res = params["layers"], params["res"]
    P = mean.shape[1]
    scale_col = inv_std.reshape(P, 1)

    if len(layers) == 1:                          # depth == 0: plain linear, no residual
        w, b = layers[0]
        return {"hidden": [],
                "w_out": (scale_col * w).astype(weight_dtype),
                "b_out": (b + shift @ w).astype(jnp.float32),
                "w_res": None}

    width = layers[0][0].shape[1]
    if pad_to is None:
        # MXU-aware padding: v6e/v7x MXUs are 256x256, but only pad that far when the
        # natural width already exceeds 128 (otherwise padded FLOPs dominate).
        pad_to = 256 if width > 128 else 128
    wp = _round_up(width, pad_to)
    pc = wp - width                               # zero padding -> lane-dense matmuls

    hidden = []
    w1, b1 = layers[0]
    hidden.append((jnp.pad(scale_col * w1, ((0, 0), (0, pc))).astype(weight_dtype),
                   jnp.pad(b1 + shift @ w1, ((0, 0), (0, pc))).astype(jnp.float32)))
    for w, b in layers[1:-1]:
        hidden.append((jnp.pad(w, ((0, pc), (0, pc))).astype(weight_dtype),
                       jnp.pad(b, ((0, 0), (0, pc))).astype(jnp.float32)))

    w_last, b_last = layers[-1]
    folded = {"hidden": hidden,
              "w_out": jnp.pad(w_last, ((0, pc), (0, 0))).astype(weight_dtype),
              "b_out": b_last.astype(jnp.float32),
              "w_res": None}
    if res is not None:
        # residual head: x_std @ res == x @ (res/std) + shift @ res
        folded["w_res"] = (scale_col * res).astype(weight_dtype)
        folded["b_out"] = (b_last + shift @ res).astype(jnp.float32)
    return folded


def _flatten_folded(folded):
    arrs = []
    for w, b in folded["hidden"]:
        arrs += [w, b]
    arrs += [folded["w_out"], folded["b_out"]]
    if folded["w_res"] is not None:
        arrs.append(folded["w_res"])
    plan = (len(folded["hidden"]), folded["w_res"] is not None)
    return arrs, plan


def _prepare_net(params):
    arrs, plan = _flatten_folded(fold_nn_params(params))
    return {"arrays": arrs, "plan": plan, "stacked": False}


def _prepare_net_stacked(params_list):
    flats = [_flatten_folded(fold_nn_params(p)) for p in params_list]
    plan = flats[0][1]
    assert all(f[1] == plan for f in flats), "env discriminators must share an architecture"
    arrs = [jnp.stack([f[0][i] for f in flats], 0) for i in range(len(flats[0][0]))]
    return {"arrays": arrs, "plan": plan, "stacked": True}


def _slice_env(stacked_net, e):
    return {"arrays": [a[e] for a in stacked_net["arrays"]],
            "plan": stacked_net["plan"], "stacked": False}


def prepare_fairnn(g_params, fs_params):
    """Fold + stack all parameters ONCE (hoisted out of the per-step forward)."""
    return {"g": _prepare_net(g_params), "f": _prepare_net_stacked(fs_params)}


# ---------------------------------------------------------------------------
# Kernel: one (env, row-tile) grid cell runs EVERY network on the shared x tile.
#   refs = [x, *params(net_0), *params(net_1), ..., out_0, out_1, ...]
#   params(net) = [W_h, b_h] * num_hidden + [W_out, b_out] (+ [W_res])
# Standardization is folded into the weights; weights are bf16, accumulation /
# bias-add / ReLU are f32 (v5e VPU has no bf16). Rows past n in a partial last tile
# flow through harmlessly (no cross-row ops) and are masked on writeback.
# ---------------------------------------------------------------------------
def _make_multi_net_kernel(plans):
    counts = [2 * nh + 2 + (1 if res else 0) for nh, res in plans]

    def net_forward(xb, prefs, nh, has_res):
        h = xb
        i = 0
        for _ in range(nh):
            w, b = prefs[i][...], prefs[i + 1][...]
            i += 2
            h = jnp.dot(h, w, preferred_element_type=jnp.float32) + b
            h = jnp.maximum(h, 0.0).astype(_COMPUTE_DTYPE)
        out = jnp.dot(h, prefs[i][...], preferred_element_type=jnp.float32)
        if has_res:
            # residual head as a second (K x 1) dot -- no concat([h, x]) VMEM copy.
            out = out + jnp.dot(xb, prefs[i + 2][...],
                                preferred_element_type=jnp.float32)
        return out + prefs[i + 1][...]

    def kernel(*refs):
        n_params = sum(counts)
        x = refs[0][...]
        xb = x.astype(_COMPUTE_DTYPE)
        p_refs = refs[1:1 + n_params]
        out_refs = refs[1 + n_params:]
        off = 0
        for (nh, res), cnt, out_ref in zip(plans, counts, out_refs):
            out_ref[...] = net_forward(xb, p_refs[off:off + cnt],
                                       nh, res).astype(out_ref.dtype)
            off += cnt

    return kernel


# ---------------------------------------------------------------------------
# pallas_call wrapper: (E, n, P) -> one (E, n, 1) output per network, ONE call.
# ---------------------------------------------------------------------------
def _pick_row_tile(n, n_env, tile_n):
    """Large row tiles amortize the ~0.35us/step grid overhead, but keep >= 2 total
    grid steps so double-buffering and v7x megacore sharding can engage."""
    if n <= 8:
        return n                                   # single tiny block (== full dim)
    tile = max(8, (min(n, tile_n) // 8) * 8)
    if n_env * _cdiv(n, tile) < 2:
        tile = min(tile, max(8, _round_up(_cdiv(n, 2), 8)))
    return tile


def _multi_net_forward(x, nets, *, tile_n=1024):
    """x: (E, n, P) f32; nets: list of prepared nets. Returns [ (E, n, 1) f32 ] per net."""
    E, n, P = x.shape
    tile = _pick_row_tile(n, E, tile_n)
    grid = (E, pl.cdiv(n, tile))

    plans = [net["plan"] for net in nets]
    kernel = _make_multi_net_kernel(plans)

    # Per-grid-step VMEM footprint of the weight/bias blocks (per-env slice).
    weight_bytes = 0
    for net in nets:
        for a in net["arrays"]:
            shp = a.shape[1:] if net["stacked"] else a.shape
            weight_bytes += int(math.prod(shp)) * a.dtype.itemsize
    # Weights only change with the (outer) env axis; single-buffer them only when the
    # set is big enough to threaten VMEM (wide discriminators on v7x's 64 MiB).
    weight_pm = pl.Buffered(1) if weight_bytes > (4 << 20) else None
    w_bufs = 1 if weight_pm is not None else 2

    def param_spec(a, stacked):
        kw = {} if weight_pm is None else {"pipeline_mode": weight_pm}
        if stacked:
            return pl.BlockSpec((None,) + a.shape[1:], lambda e, i: (e, 0, 0), **kw)
        return pl.BlockSpec(a.shape, lambda e, i: (0, 0), **kw)

    args = [x]
    in_specs = [pl.BlockSpec((None, tile, P), lambda e, i: (e, i, 0))]
    for net in nets:
        for a in net["arrays"]:
            args.append(a)
            in_specs.append(param_spec(a, net["stacked"]))

    out_shape = tuple(jax.ShapeDtypeStruct((E, n, 1), jnp.float32) for _ in nets)
    out_specs = tuple(pl.BlockSpec((None, tile, 1), lambda e, i: (e, i, 0))
                      for _ in nets)

    # Explicit VMEM budget: double-buffered x/out tiles + weight set (+ headroom).
    # Raises v5e's 16 MiB scoped default; stays within v7x's 64 MiB physical VMEM.
    x_bytes = tile * P * x.dtype.itemsize
    out_bytes = tile * 4 * len(nets)
    need = 2 * x_bytes + 2 * out_bytes + w_bufs * weight_bytes
    vmem_limit = int(min(max(2 * need, 32 << 20), 64 << 20))

    outs = pl.pallas_call(
        kernel,
        out_shape=out_shape,
        grid_spec=pltpu.PrefetchScalarGridSpec(
            num_scalar_prefetch=0,
            grid=grid,
            in_specs=in_specs,
            out_specs=out_specs,
        ),
        compiler_params=pltpu.CompilerParams(
            dimension_semantics=("parallel", "parallel"),
            vmem_limit_bytes=vmem_limit),
    )(*args)
    if not isinstance(outs, (list, tuple)):
        outs = (outs,)
    return list(outs)


def nn_module_forward(x, params, *, tile_n=1024):
    """Pallas-backed NNModule.forward: x (N, P) -> (N, 1) float32."""
    (out,) = _multi_net_forward(x[None], [_prepare_net(params)], tile_n=tile_n)
    return out[0]


def fairnn_forward(xs, g_params=None, fs_params=None, pred=False, *,
                   prepared=None, tile_n=1024):
    """FairNN.forward.
      pred=True : xs is a single (N, P) array -> g(xs).
      pred=False: xs is a list of per-env (n_e, P) arrays -> (out_g, out_f).
    Pass `prepared=prepare_fairnn(g_params, fs_params)` to avoid re-folding params."""
    if prepared is None:
        prepared = prepare_fairnn(g_params, fs_params)

    if pred:
        (out,) = _multi_net_forward(xs[None], [prepared["g"]], tile_n=tile_n)
        return out[0]

    E = len(xs)
    sizes = {int(x.shape[0]) for x in xs}
    if len(sizes) == 1 and prepared["f"]["arrays"][0].shape[0] == E:
        # Fused path: ONE pallas_call runs g AND every env discriminator on the same
        # x row tile, so x is streamed from HBM exactly once.
        x_st = jnp.stack(xs, axis=0)                        # (E, n, P), env-major
        out_g, out_f = _multi_net_forward(x_st, [prepared["g"], prepared["f"]],
                                          tile_n=tile_n)
        n = x_st.shape[1]
        return out_g.reshape(E * n, 1), out_f.reshape(E * n, 1)

    # Ragged env sizes: g over the concat + one pallas_call per env for the f's.
    x_all = jnp.concatenate(xs, axis=0)
    (out_g,) = _multi_net_forward(x_all[None], [prepared["g"]], tile_n=tile_n)
    out_fs = []
    for e in range(E):
        (o,) = _multi_net_forward(xs[e][None], [_slice_env(prepared["f"], e)],
                                  tile_n=tile_n)
        out_fs.append(o[0])
    return out_g[0], jnp.concatenate(out_fs, axis=0)


# ---------------------------------------------------------------------------
# Parameter init (deterministic; mimics nn.Linear uniform(-1/sqrt(fan_in), ...))
# ---------------------------------------------------------------------------
def init_linear(key, fan_in, fan_out, bias=True):
    kw, kb = jax.random.split(key)
    bound = 1.0 / float(jnp.sqrt(jnp.float32(fan_in)))
    w = jax.random.uniform(kw, (fan_in, fan_out), jnp.float32, -bound, bound)
    b = (jax.random.uniform(kb, (1, fan_out), jnp.float32, -bound, bound)
         if bias else None)
    return w, b


def init_nn_module(key, input_dim, depth, width, res_connect=True):
    # add_bn=False path of NNModule
    if depth >= 1:
        keys = jax.random.split(key, depth + 2)
        layers = [init_linear(keys[0], input_dim, width)]
        for i in range(depth - 1):
            layers.append(init_linear(keys[i + 1], width, width))
        layers.append(init_linear(keys[depth], width, 1))
        res = (init_linear(keys[depth + 1], input_dim, 1, bias=False)[0]
               if res_connect else None)
    else:
        layers = [init_linear(key, input_dim, 1)]
        res = None  # depth==0 -> plain linear, res_connect forced off
    return {
        "layers": layers,
        "res": res,
        "mean": jnp.zeros((1, input_dim), jnp.float32),
        "std": jnp.ones((1, input_dim), jnp.float32),
    }


# ---------------------------------------------------------------------------
# References for the self-test
# ---------------------------------------------------------------------------
def nn_module_ref(x, params):
    """Pure-JAX f32 reference of NNModule.forward (unfolded math)."""
    xs = (x - params["mean"]) / params["std"]
    h = xs
    for w, b in params["layers"][:-1]:
        h = jnp.maximum(h @ w + b, 0.0)
    w, b = params["layers"][-1]
    out = h @ w + b
    if params["res"] is not None:
        out = out + xs @ params["res"]
    return out


def _prepared_net_ref(x, net, env=None):
    """Pure-JAX forward using the SAME folded bf16 params the kernel uses (tight check)."""
    arrs = net["arrays"]
    if net["stacked"]:
        arrs = [a[env] for a in arrs]
    nh, has_res = net["plan"]
    xb = x.astype(_COMPUTE_DTYPE)
    h = xb
    i = 0
    for _ in range(nh):
        h = jnp.dot(h, arrs[i], preferred_element_type=jnp.float32) + arrs[i + 1]
        h = jnp.maximum(h, 0.0).astype(_COMPUTE_DTYPE)
        i += 2
    out = jnp.dot(h, arrs[i], preferred_element_type=jnp.float32)
    if has_res:
        out = out + jnp.dot(xb, arrs[i + 2], preferred_element_type=jnp.float32)
    return out + arrs[i + 1]


if __name__ == "__main__":
    input_dim = 16
    depth_g, width_g = 2, 32
    depth_f, width_f = 1, 32
    num_envs = 2
    n_per_env = 16

    key = jax.random.PRNGKey(0)
    k_g, k_f, k_x, k_m = jax.random.split(key, 4)

    g_params = init_nn_module(k_g, input_dim, depth_g, width_g)
    fkeys = jax.random.split(k_f, num_envs)
    fs_params = [init_nn_module(fkeys[e], input_dim, depth_f, width_f)
                 for e in range(num_envs)]

    # non-trivial standardization buffers so the mean/std folding is exercised
    mkeys = jax.random.split(k_m, 2 * (num_envs + 1))

    def set_stats(p, km, ks):
        p["mean"] = 0.5 * jax.random.normal(km, (1, input_dim), jnp.float32)
        p["std"] = 0.5 + jax.random.uniform(ks, (1, input_dim), jnp.float32)

    set_stats(g_params, mkeys[0], mkeys[1])
    for e in range(num_envs):
        set_stats(fs_params[e], mkeys[2 + 2 * e], mkeys[3 + 2 * e])

    xkeys = jax.random.split(k_x, num_envs)
    xs = [jax.random.normal(xkeys[e], (n_per_env, input_dim), jnp.float32)
          for e in range(num_envs)]
    x_all = jnp.concatenate(xs, axis=0)

    # Fold/stack parameters ONCE; jit the forward so host-side stacks/reshapes fuse.
    prepared = prepare_fairnn(g_params, fs_params)
    fused_fwd = jax.jit(lambda *xs_: fairnn_forward(list(xs_), prepared=prepared))
    pred_fwd = jax.jit(lambda x: fairnn_forward(x, pred=True, prepared=prepared))

    out_g, out_f = jax.block_until_ready(fused_fwd(*xs))
    assert out_g.shape == (num_envs * n_per_env, 1)
    assert out_f.shape == (num_envs * n_per_env, 1)

    # (a) Tight check vs. a pure-JAX forward with the SAME folded bf16 params:
    #     verifies the pallas_call plumbing (grid, BlockSpecs, g/f fusion) is exact.
    ref_g_folded = _prepared_net_ref(x_all, prepared["g"])
    ref_f_folded = jnp.concatenate(
        [_prepared_net_ref(xs[e], prepared["f"], env=e) for e in range(num_envs)], 0)
    assert jnp.allclose(out_g, ref_g_folded, rtol=2e-3, atol=2e-3), \
        float(jnp.max(jnp.abs(out_g - ref_g_folded)))
    assert jnp.allclose(out_f, ref_f_folded, rtol=2e-3, atol=2e-3), \
        float(jnp.max(jnp.abs(out_f - ref_f_folded)))

    # (b) Loose check vs. the original f32 NNModule math: the gap is the bf16
    #     weight/activation quantization chosen for MXU rate + halved HBM traffic.
    ref_g = nn_module_ref(x_all, g_params)
    ref_f = jnp.concatenate(
        [nn_module_ref(xs[e], fs_params[e]) for e in range(num_envs)], 0)
    assert jnp.allclose(out_g, ref_g, rtol=5e-2, atol=5e-2), \
        float(jnp.max(jnp.abs(out_g - ref_g)))
    assert jnp.allclose(out_f, ref_f, rtol=5e-2, atol=5e-2), \
        float(jnp.max(jnp.abs(out_f - ref_f)))

    # pred=True path (predictor only; exercises the >=2-row-tiles rule for E=1).
    pred_out = jax.block_until_ready(pred_fwd(x_all))
    assert pred_out.shape == (num_envs * n_per_env, 1)
    assert jnp.allclose(pred_out, ref_g_folded, rtol=2e-3, atol=2e-3)
    assert jnp.allclose(pred_out, ref_g, rtol=5e-2, atol=5e-2)

    print("KERNEL_OK")
</pallas_src>

<mosaic_0001>
module attributes {stable_mosaic.version = 11 : i64} {
  func.func @kernel(%arg0: i32, %arg1: i32, %arg2: memref<1x16x16xf32, #tpu.memory_space<vmem>>, %arg3: memref<16x128xbf16, #tpu.memory_space<vmem>>, %arg4: memref<1x128xf32, #tpu.memory_space<vmem>>, %arg5: memref<128x128xbf16, #tpu.memory_space<vmem>>, %arg6: memref<1x128xf32, #tpu.memory_space<vmem>>, %arg7: memref<128x1xbf16, #tpu.memory_space<vmem>>, %arg8: memref<1x1xf32, #tpu.memory_space<vmem>>, %arg9: memref<16x1xbf16, #tpu.memory_space<vmem>>, %arg10: memref<1x16x128xbf16, #tpu.memory_space<vmem>>, %arg11: memref<1x1x128xf32, #tpu.memory_space<vmem>>, %arg12: memref<1x128x1xbf16, #tpu.memory_space<vmem>>, %arg13: memref<1x1x1xf32, #tpu.memory_space<vmem>>, %arg14: memref<1x16x1xbf16, #tpu.memory_space<vmem>>, %arg15: memref<1x16x1xf32, #tpu.memory_space<vmem>>, %arg16: memref<1x16x1xf32, #tpu.memory_space<vmem>>) attributes {dimension_semantics = [#tpu.dimension_semantics<parallel>, #tpu.dimension_semantics<parallel>], iteration_bounds = array<i64: 2, 1>, scalar_prefetch = 0 : i64, scratch_operands = 0 : i64, tpu.core_type = #tpu.core_type<tc>, window_params = [{transform_indices = @transform_0, window_bounds = array<i64: 1, 16, 16>}, {pipeline_mode = #tpu.pipeline_mode<synchronous>, transform_indices = @transform_1, window_bounds = array<i64: 16, 128>}, {pipeline_mode = #tpu.pipeline_mode<synchronous>, transform_indices = @transform_2, window_bounds = array<i64: 1, 128>}, {pipeline_mode = #tpu.pipeline_mode<synchronous>, transform_indices = @transform_3, window_bounds = array<i64: 128, 128>}, {pipeline_mode = #tpu.pipeline_mode<synchronous>, transform_indices = @transform_4, window_bounds = array<i64: 1, 128>}, {pipeline_mode = #tpu.pipeline_mode<synchronous>, transform_indices = @transform_5, window_bounds = array<i64: 128, 1>}, {pipeline_mode = #tpu.pipeline_mode<synchronous>, transform_indices = @transform_6, window_bounds = array<i64: 1, 1>}, {pipeline_mode = #tpu.pipeline_mode<synchronous>, transform_indices = @transform_7, window_bounds = array<i64: 16, 1>}, {transform_indices = @transform_8, window_bounds = array<i64: 1, 16, 128>}, {transform_indices = @transform_9, window_bounds = array<i64: 1, 1, 128>}, {transform_indices = @transform_10, window_bounds = array<i64: 1, 128, 1>}, {transform_indices = @transform_11, window_bounds = array<i64: 1, 1, 1>}, {transform_indices = @transform_12, window_bounds = array<i64: 1, 16, 1>}, {transform_indices = @transform_13, window_bounds = array<i64: 1, 16, 1>}, {transform_indices = @transform_14, window_bounds = array<i64: 1, 16, 1>}]} {
    %c0 = arith.constant 0 : index
    %c0_0 = arith.constant 0 : index
    %c0_1 = arith.constant 0 : index
    %0 = vector.load %arg2[%c0, %c0_0, %c0_1] : memref<1x16x16xf32, #tpu.memory_space<vmem>>, vector<1x16x16xf32>
    %1 = vector.shape_cast %0 : vector<1x16x16xf32> to vector<16x16xf32>
    %2 = arith.truncf %1 : vector<16x16xf32> to vector<16x16xbf16>
    %c0_2 = arith.constant 0 : index
    %c0_3 = arith.constant 0 : index
    %3 = vector.load %arg3[%c0_2, %c0_3] : memref<16x128xbf16, #tpu.memory_space<vmem>>, vector<16x128xbf16>
    %c0_4 = arith.constant 0 : index
    %c0_5 = arith.constant 0 : index
    %4 = vector.load %arg4[%c0_4, %c0_5] : memref<1x128xf32, #tpu.memory_space<vmem>>, vector<1x128xf32>
    %cst = arith.constant dense<0.000000e+00> : vector<16x128xf32>
    %5 = tpu.matmul %2, %3, %cst {dimension_numbers = #tpu.dot_dimension_numbers<[1], [0], [0], [1], [0, 0, 1, 1], [], []>} : vector<16x16xbf16>, vector<16x128xbf16>, vector<16x128xf32> -> vector<16x128xf32>
    %6 = vector.broadcast %4 : vector<1x128xf32> to vector<16x128xf32>
    %7 = arith.addf %5, %6 : vector<16x128xf32>
    %cst_6 = arith.constant 0.000000e+00 : f32
    %8 = vector.broadcast %cst_6 : f32 to vector<16x128xf32>
    %9 = arith.maximumf %7, %8 : vector<16x128xf32>
    %10 = arith.truncf %9 : vector<16x128xf32> to vector<16x128xbf16>
    %c0_7 = arith.constant 0 : index
    %c0_8 = arith.constant 0 : index
    %11 = vector.load %arg5[%c0_7, %c0_8] : memref<128x128xbf16, #tpu.memory_space<vmem>>, vector<128x128xbf16>
    %c0_9 = arith.constant 0 : index
    %c0_10 = arith.constant 0 : index
    %12 = vector.load %arg6[%c0_9, %c0_10] : memref<1x128xf32, #tpu.memory_space<vmem>>, vector<1x128xf32>
    %cst_11 = arith.constant dense<0.000000e+00> : vector<16x128xf32>
    %13 = tpu.matmul %10, %11, %cst_11 {dimension_numbers = #tpu.dot_dimension_numbers<[1], [0], [0], [1], [0, 0, 1, 1], [], []>} : vector<16x128xbf16>, vector<128x128xbf16>, vector<16x128xf32> -> vector<16x128xf32>
    %14 = vector.broadcast %12 : vector<1x128xf32> to vector<16x128xf32>
    %15 = arith.addf %13, %14 : vector<16x128xf32>
    %cst_12 = arith.constant 0.000000e+00 : f32
    %16 = vector.broadcast %cst_12 : f32 to vector<16x128xf32>
    %17 = arith.maximumf %15, %16 : vector<16x128xf32>
    %18 = arith.truncf %17 : vector<16x128xf32> to vector<16x128xbf16>
    %c0_13 = arith.constant 0 : index
    %c0_14 = arith.constant 0 : index
    %19 = vector.load %arg7[%c0_13, %c0_14] : memref<128x1xbf16, #tpu.memory_space<vmem>>, vector<128x1xbf16>
    %cst_15 = arith.constant dense<0.000000e+00> : vector<16x1xf32>
    %20 = tpu.matmul %18, %19, %cst_15 {dimension_numbers = #tpu.dot_dimension_numbers<[1], [0], [0], [1], [0, 0, 1, 1], [], []>} : vector<16x128xbf16>, vector<128x1xbf16>, vector<16x1xf32> -> vector<16x1xf32>
    %c0_16 = arith.constant 0 : index
    %c0_17 = arith.constant 0 : index
    %21 = vector.load %arg9[%c0_16, %c0_17] : memref<16x1xbf16, #tpu.memory_space<vmem>>, vector<16x1xbf16>
    %cst_18 = arith.constant dense<0.000000e+00> : vector<16x1xf32>
    %22 = tpu.matmul %2, %21, %cst_18 {dimension_numbers = #tpu.dot_dimension_numbers<[1], [0], [0], [1], [0, 0, 1, 1], [], []>} : vector<16x16xbf16>, vector<16x1xbf16>, vector<16x1xf32> -> vector<16x1xf32>
    %23 = arith.addf %20, %22 : vector<16x1xf32>
    %c0_19 = arith.constant 0 : index
    %c0_20 = arith.constant 0 : index
    %24 = vector.load %arg8[%c0_19, %c0_20] : memref<1x1xf32, #tpu.memory_space<vmem>>, vector<1x1xf32>
    %25 = vector.broadcast %24 : vector<1x1xf32> to vector<16x1xf32>
    %26 = arith.addf %23, %25 : vector<16x1xf32>
    %c0_21 = arith.constant 0 : index
    %c0_22 = arith.constant 0 : index
    %c0_23 = arith.constant 0 : index
    %27 = vector.load %arg15[%c0_21, %c0_22, %c0_23] : memref<1x16x1xf32, #tpu.memory_space<vmem>>, vector<1x16x1xf32>
    %28 = vector.shape_cast %27 : vector<1x16x1xf32> to vector<16x1xf32>
    %29 = vector.shape_cast %26 : vector<16x1xf32> to vector<1x16x1xf32>
    tpu.vector_store %arg15[%c0_21, %c0_22, %c0_23], %29 {strides = array<i32>} : memref<1x16x1xf32, #tpu.memory_space<vmem>>, vector<1x16x1xf32>,
    %c0_24 = arith.constant 0 : index
    %c0_25 = arith.constant 0 : index
    %c0_26 = arith.constant 0 : index
    %30 = vector.load %arg10[%c0_24, %c0_25, %c0_26] : memref<1x16x128xbf16, #tpu.memory_space<vmem>>, vector<1x16x128xbf16>
    %31 = vector.shape_cast %30 : vector<1x16x128xbf16> to vector<16x128xbf16>
    %c0_27 = arith.constant 0 : index
    %c0_28 = arith.constant 0 : index
    %c0_29 = arith.constant 0 : index
    %32 = vector.load %arg11[%c0_27, %c0_28, %c0_29] : memref<1x1x128xf32, #tpu.memory_space<vmem>>, vector<1x1x128xf32>
    %33 = vector.shape_cast %32 : vector<1x1x128xf32> to vector<1x128xf32>
    %cst_30 = arith.constant dense<0.000000e+00> : vector<16x128xf32>
    %34 = tpu.matmul %2, %31, %cst_30 {dimension_numbers = #tpu.dot_dimension_numbers<[1], [0], [0], [1], [0, 0, 1, 1], [], []>} : vector<16x16xbf16>, vector<16x128xbf16>, vector<16x128xf32> -> vector<16x128xf32>
    %35 = vector.broadcast %33 : vector<1x128xf32> to vector<16x128xf32>
    %36 = arith.addf %34, %35 : vector<16x128xf32>
    %cst_31 = arith.constant 0.000000e+00 : f32
    %37 = vector.broadcast %cst_31 : f32 to vector<16x128xf32>
    %38 = arith.maximumf %36, %37 : vector<16x128xf32>
    %39 = arith.truncf %38 : vector<16x128xf32> to vector<16x128xbf16>
    %c0_32 = arith.constant 0 : index
    %c0_33 = arith.constant 0 : index
    %c0_34 = arith.constant 0 : index
    %40 = vector.load %arg12[%c0_32, %c0_33, %c0_34] : memref<1x128x1xbf16, #tpu.memory_space<vmem>>, vector<1x128x1xbf16>
    %41 = vector.shape_cast %40 : vector<1x128x1xbf16> to vector<128x1xbf16>
    %cst_35 = arith.constant dense<0.000000e+00> : vector<16x1xf32>
    %42 = tpu.matmul %39, %41, %cst_35 {dimension_numbers = #tpu.dot_dimension_numbers<[1], [0], [0], [1], [0, 0, 1, 1], [], []>} : vector<16x128xbf16>, vector<128x1xbf16>, vector<16x1xf32> -> vector<16x1xf32>
    %c0_36 = arith.constant 0 : index
    %c0_37 = arith.constant 0 : index
    %c0_38 = arith.constant 0 : index
    %43 = vector.load %arg14[%c0_36, %c0_37, %c0_38] : memref<1x16x1xbf16, #tpu.memory_space<vmem>>, vector<1x16x1xbf16>
    %44 = vector.shape_cast %43 : vector<1x16x1xbf16> to vector<16x1xbf16>
    %cst_39 = arith.constant dense<0.000000e+00> : vector<16x1xf32>
    %45 = tpu.matmul %2, %44, %cst_39 {dimension_numbers = #tpu.dot_dimension_numbers<[1], [0], [0], [1], [0, 0, 1, 1], [], []>} : vector<16x16xbf16>, vector<16x1xbf16>, vector<16x1xf32> -> vector<16x1xf32>
    %46 = arith.addf %42, %45 : vector<16x1xf32>
    %c0_40 = arith.constant 0 : index
    %c0_41 = arith.constant 0 : index
    %c0_42 = arith.constant 0 : index
    %47 = vector.load %arg13[%c0_40, %c0_41, %c0_42] : memref<1x1x1xf32, #tpu.memory_space<vmem>>, vector<1x1x1xf32>
    %48 = vector.shape_cast %47 : vector<1x1x1xf32> to vector<1x1xf32>
    %49 = vector.broadcast %48 : vector<1x1xf32> to vector<16x1xf32>
    %50 = arith.addf %46, %49 : vector<16x1xf32>
    %c0_43 = arith.constant 0 : index
    %c0_44 = arith.constant 0 : index
    %c0_45 = arith.constant 0 : index
    %51 = vector.load %arg16[%c0_43, %c0_44, %c0_45] : memref<1x16x1xf32, #tpu.memory_space<vmem>>, vector<1x16x1xf32>
    %52 = vector.shape_cast %51 : vector<1x16x1xf32> to vector<16x1xf32>
    %53 = vector.shape_cast %50 : vector<16x1xf32> to vector<1x16x1xf32>
    tpu.vector_store %arg16[%c0_43, %c0_44, %c0_45], %53 {strides = array<i32>} : memref<1x16x1xf32, #tpu.memory_space<vmem>>, vector<1x16x1xf32>,
    return
  }
  func.func @transform_0(%arg0: i32, %arg1: i32) -> (i32, i32, i32) {
    %c0_i32 = arith.constant 0 : i32
    %c0_i32_0 = arith.constant 0 : i32
    return %arg0, %arg1, %c0_i32 : i32, i32, i32
  }
  func.func @transform_1(%arg0: i32, %arg1: i32) -> (i32, i32) {
    %c0_i32 = arith.constant 0 : i32
    %c0_i32_0 = arith.constant 0 : i32
    %c0_i32_1 = arith.constant 0 : i32
    return %c0_i32, %c0_i32_0 : i32, i32
  }
  func.func @transform_2(%arg0: i32, %arg1: i32) -> (i32, i32) {
    %c0_i32 = arith.constant 0 : i32
    %c0_i32_0 = arith.constant 0 : i32
    %c0_i32_1 = arith.constant 0 : i32
    return %c0_i32, %c0_i32_0 : i32, i32
  }
  func.func @transform_3(%arg0: i32, %arg1: i32) -> (i32, i32) {
    %c0_i32 = arith.constant 0 : i32
    %c0_i32_0 = arith.constant 0 : i32
    %c0_i32_1 = arith.constant 0 : i32
    return %c0_i32, %c0_i32_0 : i32, i32
  }
  func.func @transform_4(%arg0: i32, %arg1: i32) -> (i32, i32) {
    %c0_i32 = arith.constant 0 : i32
    %c0_i32_0 = arith.constant 0 : i32
    %c0_i32_1 = arith.constant 0 : i32
    return %c0_i32, %c0_i32_0 : i32, i32
  }
  func.func @transform_5(%arg0: i32, %arg1: i32) -> (i32, i32) {
    %c0_i32 = arith.constant 0 : i32
    %c0_i32_0 = arith.constant 0 : i32
    %c0_i32_1 = arith.constant 0 : i32
    return %c0_i32, %c0_i32_0 : i32, i32
  }
  func.func @transform_6(%arg0: i32, %arg1: i32) -> (i32, i32) {
    %c0_i32 = arith.constant 0 : i32
    %c0_i32_0 = arith.constant 0 : i32
    %c0_i32_1 = arith.constant 0 : i32
    return %c0_i32, %c0_i32_0 : i32, i32
  }
  func.func @transform_7(%arg0: i32, %arg1: i32) -> (i32, i32) {
    %c0_i32 = arith.constant 0 : i32
    %c0_i32_0 = arith.constant 0 : i32
    %c0_i32_1 = arith.constant 0 : i32
    return %c0_i32, %c0_i32_0 : i32, i32
  }
  func.func @transform_8(%arg0: i32, %arg1: i32) -> (i32, i32, i32) {
    %c0_i32 = arith.constant 0 : i32
    %c0_i32_0 = arith.constant 0 : i32
    %c0_i32_1 = arith.constant 0 : i32
    return %arg0, %c0_i32, %c0_i32_0 : i32, i32, i32
  }
  func.func @transform_9(%arg0: i32, %arg1: i32) -> (i32, i32, i32) {
    %c0_i32 = arith.constant 0 : i32
    %c0_i32_0 = arith.constant 0 : i32
    %c0_i32_1 = arith.constant 0 : i32
    return %arg0, %c0_i32, %c0_i32_0 : i32, i32, i32
  }
  func.func @transform_10(%arg0: i32, %arg1: i32) -> (i32, i32, i32) {
    %c0_i32 = arith.constant 0 : i32
    %c0_i32_0 = arith.constant 0 : i32
    %c0_i32_1 = arith.constant 0 : i32
    return %arg0, %c0_i32, %c0_i32_0 : i32, i32, i32
  }
  func.func @transform_11(%arg0: i32, %arg1: i32) -> (i32, i32, i32) {
    %c0_i32 = arith.constant 0 : i32
    %c0_i32_0 = arith.constant 0 : i32
    %c0_i32_1 = arith.constant 0 : i32
    return %arg0, %c0_i32, %c0_i32_0 : i32, i32, i32
  }
  func.func @transform_12(%arg0: i32, %arg1: i32) -> (i32, i32, i32) {
    %c0_i32 = arith.constant 0 : i32
    %c0_i32_0 = arith.constant 0 : i32
    %c0_i32_1 = arith.constant 0 : i32
    return %arg0, %c0_i32, %c0_i32_0 : i32, i32, i32
  }
  func.func @transform_13(%arg0: i32, %arg1: i32) -> (i32, i32, i32) {
    %c0_i32 = arith.constant 0 : i32
    %c0_i32_0 = arith.constant 0 : i32
    return %arg0, %arg1, %c0_i32 : i32, i32, i32
  }
  func.func @transform_14(%arg0: i32, %arg1: i32) -> (i32, i32, i32) {
    %c0_i32 = arith.constant 0 : i32
    %c0_i32_0 = arith.constant 0 : i32
    return %arg0, %arg1, %c0_i32 : i32, i32, i32
  }
}

</mosaic_0001>

<bundles_post_ra>
// kernel: _lambda_.1
= control target key start
LH: loop header
LB: loop body
LE: loop exit
PB: predicated region body
PF: predicated region fallthrough
CT: control target
= control target key end

     0   :  { %s2674_s0 = inlined_call_operand.vmem [shape: f32[2,16,16], index: 0, kind: input, shape index: {}]   ;;  %s2675_s1 = inlined_call_operand.hbm [shape: bf16[16,128], index: 1, kind: input, shape index: {}]   ;;  %s2676_s2 = inlined_call_operand.hbm [shape: f32[1,128], index: 2, kind: input, shape index: {}]   ;;  %s2677_s3 = inlined_call_operand.hbm [shape: bf16[128,128], index: 3, kind: input, shape index: {}]   ;;  %s2678_s4 = inlined_call_operand.vmem [shape: f32[1,128], index: 4, kind: input, shape index: {}]   ;;  %s2679_s5 = inlined_call_operand.hbm [shape: bf16[128,1], index: 5, kind: input, shape index: {}]   ;;  %s2680_s6 = inlined_call_operand.<no memory space> [shape: f32[1,1], index: 6, kind: input, shape index: {}]   ;;  %s2681_s7 = inlined_call_operand.hbm [shape: bf16[16,1], index: 7, kind: input, shape index: {}]   ;;  %s2682_s8 = inlined_call_operand.hbm [shape: bf16[2,16,128], index: 8, kind: input, shape index: {}]   ;;  %s2683_s9 = inlined_call_operand.hbm [shape: f32[2,1,128], index: 9, kind: input, shape index: {}]   ;;  %s2684_s10 = inlined_call_operand.vmem [shape: bf16[2,128,1], index: 10, kind: input, shape index: {}]   ;;  %s2685_s11 = inlined_call_operand.vmem [shape: f32[2,1,1], index: 11, kind: input, shape index: {}]   ;;  %s2686_s12 = inlined_call_operand.vmem [shape: bf16[2,16,1], index: 12, kind: input, shape index: {}]   ;;  %s2687_s13 = inlined_call_operand.vmem [shape: f32[2,16,1], index: 13, kind: output, shape index: {0}]   ;;  %s2688_s14 = inlined_call_operand.vmem [shape: f32[2,16,1], index: 14, kind: output, shape index: {1}]  }
   0x1   :  { %2705 = sst [smem:[#allocation20_spill]] %s2674_s0  ;;  %v20_v0 = vstv %s2680_s6 }
   0x2   :  { %2706 = sst [smem:[#allocation21_spill]] %s2675_s1  ;;  %21 = vst [vmem:[#allocation2] sm:$0x1] %v20_v0 }
   0x3   :  { %2707 = sst [smem:[#allocation22_spill]] %s2676_s2 }
   0x4   :  { %2708 = sst [smem:[#allocation23_spill]] %s2678_s4 }
   0x5   :  { %2709 = sst [smem:[#allocation24_spill]] %s2679_s5 }
   0x6   :  { %2710 = sst [smem:[#allocation25_spill]] %s2682_s8 }
   0x7   :  { %2711 = sst [smem:[#allocation26_spill]] %s2684_s10 }
   0x8   :  { %2712 = sst [smem:[#allocation27_spill]] %s2685_s11 }
   0x9   :  { %2713 = sst [smem:[#allocation28_spill]] %s2686_s12 }
   0xa   :  { %2714 = sst [smem:[#allocation29_spill]] %s2687_s13 }
   0xb   :  { %2715 = sst [smem:[#allocation30_spill]] %s2688_s14 }
   0xc   :  { %22 = vsyncpa [#allocation4], 0 }
   0xd   :  { %23 = vsyncpa [#allocation6], 0 }
   0xe   :  { %24 = vsyncpa [#allocation9], 0 }
   0xf   :  { %25 = vsyncpa [#allocation12], 0 }
  0x10   :  { %27 = vsyncpa [#allocation12 + $0x1], 0  ;;  %s2251_s15 = smov 0   ;;  %s2253_s16 = smov 0  }
  0x11   :  { %s2255_s17 = smov 0   ;;  %s2257_s18 = smov 0  }
  0x12   :  { %s2259_s19 = smov 0   ;;  %s2261_s20 = smov 0  }
  0x13 LB: > { %s2162_s6 = smov [#allocation5]   ;;  %s2689_s22 = sadd.s32 4294967295, %s2160_s20   ;;  %s2160_s20 = sphi %s2261_s20, %s33_s20   ;;  %s2156_s19 = sphi %s2259_s19, %s2754_s19   ;;  %s2152_s18 = sphi %s2257_s18, %s2753_s18   ;;  %s2148_s17 = sphi %s2255_s17, %s2752_s17   ;;  %s2144_s16 = sphi %s2253_s16, %s2751_s16   ;;  %s2140_s15 = sphi %s2251_s15, %s2750_s15  }
  0x14   : > { %s437_s21 = sshll.u32 %s2162_s6, 4  ;;  %p1563_p0 = scmp.ge.s32.totalorder %s2160_s20, 1  ;;  %s438_s21 = int_to_ptr.vmem [resolvable:$true] %s437_s21 }
  0x15   : > { %p2285_p1 = scmp.eq.s32.totalorder %s2689_s22, 0  ;;  %p411_p2 = scmp.lt.s32.totalorder %s2160_s20, 3 }
  0x16   : > { %s2163_s25 = smov [#allocation8]   ;;  %s2719_s2 = sld [smem:[#allocation22_spill]] }
  0x17   : > { %s2716_s23 = scalar_select %p2285_p1, 1, 0 }
  0x18   : > { %p2290_p3 = pnand %p1563_p0, %p411_p2  ;;  %s463_s26 = sshll.u32 %s2163_s25, 4  ;;  %s2302_s26 = int_to_ptr.vmem [resolvable:$true] %s463_s26 }
  0x1a   : > { %s2717_s24 = scalar_select %p2290_p3, 1, 0 }
  0x1b   : > { %p1779_p4 = pneg %p2290_p3 }
  0x1c   : > { %s1898_s30 = scalar_lea.hbm %s2719_s2, 16 }
  0x1d   : > { %p2298_p5 = pnand %p1779_p4, %p2285_p1  ;;  %p1899_p6 = scmp.ne.s32.totalorder %s2719_s2, %s1898_s30 }
  0x1e   : > { %p1905_p10 = scmp.lt.u32.totalorder %s1898_s30, %s2719_s2 }
  0x1f   : > { %s2718_s27 = scalar_select %p2298_p5, 1, 0 }
  0x20   : > { %p2312_p7 = pneg %p2298_p5 }
  0x22   : > { %p1901_p8 = pnand %p2312_p7, %p1899_p6 }
  0x24   : > { %p1902_p9 = pneg %p1901_p8 }
  0x26   : > { %p1907_p11 = pnand %p1905_p10, %p1902_p9 }
  0x28   : > { %1910 = shalt.err (!%p1907_p11)
}
  0x29   : > { %s1911_s28 = scalar_lea.vmem %s438_s21, 16  ;;  %s1918_s22 = scalar_lea.vmem %s438_s21, 32 }
  0x2a   : > { %p1912_p12 = scmp.ne.s32.totalorder %s438_s21, %s1911_s28  ;;  %p1919_p2 = scmp.lt.s32.totalorder %s438_s21, %s438_s21 }
  0x2b   : > { %p1920_p4 = scmp.lt.s32.totalorder %s1918_s22, %s1911_s28 }
  0x2c   : > { %p1914_p13 = pnand %p1912_p12, %p2312_p7 }
  0x2d   : > { %p1921_p3 = por %p1920_p4, %p1919_p2 }
  0x2e   : > { %p1915_p0 = pneg %p1914_p13 }
  0x30   : > { %p1922_p1 = pnand %p1921_p3, %p1915_p0 }
  0x32   : > { %1925 = shalt.err (!%p1922_p1)
}
  0x33   : > { %1785 = dma.hbm_to_vmem [thread:$0]  (!%p2298_p5), %s2719_s2, 16, %s438_s21, [#allocation6]  }
  0x34   : > { %s2721_s5 = sld [smem:[#allocation24_spill]] }
  0x3a   : > { %s1926_s25 = scalar_lea.hbm %s2721_s5, 1024 }
  0x3b   : > { %p1927_p6 = scmp.ne.s32.totalorder %s2721_s5, %s1926_s25  ;;  %p1933_p1 = scmp.lt.u32.totalorder %s1926_s25, %s2721_s5 }
  0x3d   : > { %p1929_p8 = pnand %p1927_p6, %p2312_p7 }
  0x3f   : > { %p1930_p9 = pneg %p1929_p8 }
  0x41   : > { %p1935_p3 = pnand %p1933_p1, %p1930_p9 }
  0x43   : > { %1938 = shalt.err (!%p1935_p3)
}
  0x44   : > { %s1939_s21 = scalar_lea.vmem %s2302_s26, 1024  ;;  %p1947_p13 = scmp.lt.s32.totalorder %s2302_s26, %s2302_s26 }
  0x45   : > { %p1940_p10 = scmp.ne.s32.totalorder %s2302_s26, %s1939_s21  ;;  %p1948_p0 = scmp.lt.s32.totalorder %s1939_s21, %s1939_s21 }
  0x47   : > { %p1942_p11 = pnand %p1940_p10, %p2312_p7  ;;  %p1949_p2 = por %p1948_p0, %p1947_p13 }
  0x49   : > { %p1943_p12 = pneg %p1942_p11 }
  0x4b   : > { %p1950_p4 = pnand %p1949_p2, %p1943_p12 }
  0x4d   : > { %1953 = shalt.err (!%p1950_p4)
}
  0x4e   : > { %s2693_s4 = smov 64   ;;  %s2695_s13 = smov 4  }
  0x4f   : > { %1791 = dma.hbm_to_vmem [thread:$0]  (!%p2298_p5), %s2721_s5, 1024, %s2302_s26, [#allocation9], %s2693_s4, %s2693_s4, %s2695_s13  }
  0x50   : > { %s45_s11 = sadd.s32 1, %s2156_s19  ;;  %s227_s30 = sadd.s32 1, %s2148_s17 }
  0x51   : > { %p47_p6 = scmp.ge.s32.totalorder %s45_s11, 2  ;;  %p234_p8 = scmp.ne.s32.totalorder %s2148_s17, %s2144_s16 }
  0x52   : > { %p235_p9 = scmp.eq.s32.totalorder %s2160_s20, 0  ;;  %p240_p1 = scmp.ne.s32.totalorder %s2144_s16, %s2140_s15 }
  0x53   : > { %s2756_s11 = smov (%p47_p6, %s45_s11), 0  ;;  %p2724_p10 = scmp.ne.s32.totalorder %s2716_s23, 0 }
  0x54   : > { %2722 = sst [smem:[#allocation18_spill]] %s2756_s11  ;;  %p2363_p3 = por %p235_p9, %p234_p8 }
  0x55   : > { %p2369_p11 = por %p2724_p10, %p240_p1  ;;  %s224_s26 = ssub.s32 %s2156_s19, %s2756_s11 }
  0x56   : > { %p1807_p12 = scmp.lt.s32.totalorder %s2160_s20, 2  ;;  %p225_p13 = scmp.eq.s32.totalorder %s224_s26, 0 }
  0x57   : > { %s2725_s28 = scalar_select %p2369_p11, 1, 0 }
  0x58   : > { %s506_s22 = sand.u32 1, %s2160_s20   ;;  %s2701_s21 = sand.u32 1, %s2148_s17  }
  0x59   : > { %s2379_s29 = scalar_select %p225_p13, %s2148_s17, %s227_s30  }
  0x5a   : > { %s1570_s15 = sshll.u32 %s2701_s21, 3  ;;  %s1630_s6 = sshll.u32 %s2156_s19, 7 }
  0x5b   : > { %2726 = sst [smem:[#allocation19_spill]] %s2379_s29  ;;  %s2727_s8 = sld [smem:[#allocation25_spill]] }
  0x5c   : > { %s510_s5 = scalar_lea.vmem [#allocation11], %s1570_s15  ;;  %p2391_p0 = pnand %p1807_p12, %p2363_p3 }
  0x5d   : > { %s517_s11 = sshll.u32 %s510_s5, 4  ;;  %s2397_s30 = scalar_lea.sflag [#allocation12], %s506_s22  ;;  %s2395_s11 = int_to_ptr.vmem [resolvable:$true] %s517_s11 }
  0x5e   : > { %s2728_s26 = scalar_select %p2391_p0, 1, 0 }
  0x5f   : > { %p2702_p4 = pneg %p2391_p0 }
  0x61   : > { %s2387_s2 = scalar_lea.hbm %s2727_s8, %s1630_s6  ;;  %s1959_s25 = scalar_lea.hbm %s2727_s8, 256 }
  0x62   : > { %s1954_s4 = scalar_lea.hbm %s2387_s2, 128  ;;  %p1960_p9 = scmp.lt.u32.totalorder %s2387_s2, %s2727_s8 }
  0x63   : > { %p1955_p2 = scmp.ne.s32.totalorder %s2387_s2, %s1954_s4  ;;  %p1961_p1 = scmp.lt.u32.totalorder %s1959_s25, %s1954_s4 }
  0x64   : > { %p1963_p10 = scmp.lt.u32.totalorder %s1954_s4, %s2387_s2 }
  0x65   : > { %p1957_p6 = pnand %p2702_p4, %p1955_p2  ;;  %p1962_p3 = por %p1961_p1, %p1960_p9 }
  0x67   : > { %p1958_p8 = pneg %p1957_p6  ;;  %p1964_p12 = por %p1963_p10, %p1962_p3 }
  0x69   : > { %p1965_p13 = pnand %p1964_p12, %p1958_p8 }
  0x6b   : > { %1968 = shalt.err (!%p1965_p13)
}
  0x6c   : > { %s1969_s22 = scalar_lea.vmem %s2395_s11, 128  ;;  %s2166_s5 = smov [#allocation11]  }
  0x6d   : > { %p1970_p2 = scmp.ne.s32.totalorder %s2395_s11, %s1969_s22  ;;  %s1974_s13 = sshll.u32 %s2166_s5, 4  ;;  %s1975_s13 = int_to_ptr.vmem [resolvable:$false] %s1974_s13 }
  0x6e   : > { %s1976_s15 = scalar_lea.vmem %s1975_s13, 256  ;;  %p1977_p5 = scmp.lt.s32.totalorder %s2395_s11, %s1975_s13 }
  0x6f   : > { %p1972_p6 = pnand %p1970_p2, %p2702_p4  ;;  %p1978_p9 = scmp.lt.s32.totalorder %s1976_s15, %s1969_s22 }
  0x71   : > { %p1973_p11 = pneg %p1972_p6  ;;  %p1979_p1 = por %p1978_p9, %p1977_p5 }
  0x73   : > { %p1980_p3 = pnand %p1979_p1, %p1973_p11 }
  0x75   : > { %1983 = shalt.err (!%p1980_p3)
}
  0x76   : > { %s2729_s4 = smov 4   ;;  %s2730_s25 = smov 64  }
  0x77   : > { %1798 = dma.hbm_to_vmem [thread:$0]  (!%p2391_p0), %s2387_s2, 128, %s2395_s11, %s2397_s30, %s2730_s25, %s2730_s25, %s2729_s4  }
  0x78   : > { %s2167_s6 = smov [#allocation3]   ;;  %s2168_s5 = smov [#allocation7]  }
  0x79   : > { %s423_s21 = sshll.u32 %s2167_s6, 4  ;;  %s447_s8 = sshll.u32 %s2168_s5, 4  ;;  %s424_s21 = int_to_ptr.vmem [resolvable:$true] %s423_s21  ;;  %s2428_s8 = int_to_ptr.vmem [resolvable:$true] %s447_s8 }
  0x7a   : > { %s2731_s1 = sld [smem:[#allocation21_spill]] }
  0x80   : > { %s1984_s15 = scalar_lea.hbm %s2731_s1, 128 }
  0x81   : > { %p1985_p5 = scmp.ne.s32.totalorder %s2731_s1, %s1984_s15  ;;  %p1991_p10 = scmp.lt.u32.totalorder %s1984_s15, %s2731_s1 }
  0x83   : > { %p1987_p11 = pnand %p1985_p5, %p2312_p7 }
  0x85   : > { %p1988_p8 = pneg %p1987_p11 }
  0x87   : > { %p1993_p12 = pnand %p1991_p10, %p1988_p8 }
  0x89   : > { %1996 = shalt.err (!%p1993_p12)
}
  0x8a   : > { %s1997_s11 = scalar_lea.vmem %s424_s21, 128  ;;  %p2005_p9 = scmp.lt.s32.totalorder %s424_s21, %s424_s21 }
  0x8b   : > { %p1998_p13 = scmp.ne.s32.totalorder %s424_s21, %s1997_s11  ;;  %p2006_p1 = scmp.lt.s32.totalorder %s1997_s11, %s1997_s11 }
  0x8d   : > { %p2000_p2 = pnand %p1998_p13, %p2312_p7  ;;  %p2007_p3 = por %p2006_p1, %p2005_p9 }
  0x8f   : > { %p2001_p6 = pneg %p2000_p2 }
  0x91   : > { %p2008_p4 = pnand %p2007_p3, %p2001_p6 }
  0x93   : > { %2011 = shalt.err (!%p2008_p4)
}
  0x94   : > { %p2732_p5 = scmp.ne.s32.totalorder %s2718_s27, 0  ;;  %s2012_s5 = scalar_lea.hbm %s2677_s3, 1024 }
  0x95   : > { %p2013_p11 = scmp.ne.s32.totalorder %s2677_s3, %s2012_s5  ;;  %p2019_p10 = scmp.lt.u32.totalorder %s2012_s5, %s2677_s3 }
  0x96   : > { %1782 = dma.hbm_to_vmem [thread:$0]  (!%p2732_p5), %s2731_s1, 128, %s424_s21, [#allocation4], %s2730_s25, %s2730_s25, %s2729_s4  }
  0x97   : > { %p2015_p4 = pnand %p2013_p11, %p2312_p7 }
  0x99   : > { %p2016_p8 = pneg %p2015_p4 }
  0x9b   : > { %p2021_p12 = pnand %p2019_p10, %p2016_p8 }
  0x9d   : > { %2024 = shalt.err (!%p2021_p12)
}
  0x9e   : > { %s2025_s21 = scalar_lea.vmem %s2428_s8, 1024  ;;  %p2033_p9 = scmp.lt.s32.totalorder %s2428_s8, %s2428_s8 }
  0x9f   : > { %p2026_p13 = scmp.ne.s32.totalorder %s2428_s8, %s2025_s21  ;;  %p2034_p1 = scmp.lt.s32.totalorder %s2025_s21, %s2025_s21 }
  0xa1   : > { %p2028_p2 = pnand %p2026_p13, %p2312_p7  ;;  %p2035_p3 = por %p2034_p1, %p2033_p9 }
  0xa3   : > { %p2029_p6 = pneg %p2028_p2 }
  0xa5   : > { %p2036_p11 = pnand %p2035_p3, %p2029_p6 }
  0xa7   : > { %2039 = shalt.err (!%p2036_p11)
}
  0xa8   : > { %1788 = dma.hbm_to_vmem [thread:$0]  (!%p2732_p5), %s2677_s3, 1024, %s2428_s8, [#allocation6], %s2730_s25, %s2730_s25, %s2729_s4  }
  0xa9   : > { %s2169_s12 = smov [#allocation10]   ;;  %s1573_s6 = sshll.u32 %s2156_s19, 4 }
  0xaa   : > { %s479_s29 = sshll.u32 %s2169_s12, 4  ;;  %s2481_s13 = scalar_lea.hbm %s2683_s9, %s1573_s6  ;;  %s480_s29 = int_to_ptr.vmem [resolvable:$true] %s479_s29 }
  0xab   : > { %s2040_s21 = scalar_lea.hbm %s2681_s7, 128 }
  0xac   : > { %p2041_p4 = scmp.ne.s32.totalorder %s2681_s7, %s2040_s21  ;;  %p2047_p12 = scmp.lt.u32.totalorder %s2040_s21, %s2681_s7 }
  0xae   : > { %p2043_p8 = pnand %p2041_p4, %p2312_p7 }
  0xb0   : > { %p2044_p10 = pneg %p2043_p8 }
  0xb2   : > { %p2049_p13 = pnand %p2047_p12, %p2044_p10 }
  0xb4   : > { %2052 = shalt.err (!%p2049_p13)
}
  0xb5   : > { %s2053_s10 = scalar_lea.vmem %s480_s29, 128  ;;  %p2061_p1 = scmp.lt.s32.totalorder %s480_s29, %s480_s29 }
  0xb6   : > { %p2054_p2 = scmp.ne.s32.totalorder %s480_s29, %s2053_s10  ;;  %p2062_p3 = scmp.lt.s32.totalorder %s2053_s10, %s2053_s10 }
  0xb8   : > { %p2056_p6 = pnand %p2054_p2, %p2312_p7  ;;  %p2063_p11 = por %p2062_p3, %p2061_p1 }
  0xba   : > { %p2057_p9 = pneg %p2056_p6 }
  0xbc   : > { %p2064_p0 = pnand %p2063_p11, %p2057_p9 }
  0xbe   : > { %2067 = shalt.err (!%p2064_p0)
}
  0xbf   : > { %1794 = dma.hbm_to_vmem [thread:$0]  (!%p2732_p5), %s2681_s7, 128, %s480_s29, [#allocation9], %s2730_s25, %s2730_s25, %s2729_s4  }
  0xc0   : > { %s2733_s14 = sand.u32 1, %s2148_s17   ;;  %s2068_s5 = scalar_lea.hbm %s2481_s13, 16 }
  0xc1   : > { %s530_s12 = scalar_lea.vmem [#allocation13], %s2733_s14  ;;  %p2069_p7 = scmp.ne.s32.totalorder %s2481_s13, %s2068_s5 }
  0xc2   : > { %s537_s6 = sshll.u32 %s530_s12, 4  ;;  %p2734_p0 = scmp.ne.s32.totalorder %s2728_s26, 0  ;;  %s538_s6 = int_to_ptr.vmem [resolvable:$true] %s537_s6 }
  0xc3   : > { %s2073_s15 = scalar_lea.hbm %s2683_s9, 32  ;;  %p2074_p12 = scmp.lt.u32.totalorder %s2481_s13, %s2683_s9 }
  0xc4   : > { %p2735_p4 = pneg %p2734_p0  ;;  %p2075_p13 = scmp.lt.u32.totalorder %s2073_s15, %s2068_s5 }
  0xc5   : > { %p2077_p2 = scmp.lt.u32.totalorder %s2068_s5, %s2481_s13 }
  0xc6   : > { %p2071_p8 = pnand %p2069_p7, %p2735_p4  ;;  %p2076_p5 = por %p2075_p13, %p2074_p12 }
  0xc8   : > { %p2072_p10 = pneg %p2071_p8  ;;  %p2078_p6 = por %p2077_p2, %p2076_p5 }
  0xca   : > { %p2079_p9 = pnand %p2078_p6, %p2072_p10 }
  0xcc   : > { %2082 = shalt.err (!%p2079_p9)
}
  0xcd   : > { %s2083_s4 = scalar_lea.vmem %s538_s6, 16  ;;  %p2736_p3 = pmov %p2735_p4 }
  0xce   : > { %p2084_p1 = scmp.ne.s32.totalorder %s538_s6, %s2083_s4  ;;  %s2170_s25 = smov [#allocation13]  }
  0xcf   : > { %s2088_s29 = sshll.u32 %s2170_s25, 4  ;;  %s2089_s29 = int_to_ptr.vmem [resolvable:$false] %s2088_s29 }
  0xd0   : > { %p2086_p11 = pnand %p2084_p1, %p2736_p3  ;;  %s2090_s8 = scalar_lea.vmem %s2089_s29, 32 }
  0xd1   : > { %p2091_p4 = scmp.lt.s32.totalorder %s538_s6, %s2089_s29  ;;  %p2092_p8 = scmp.lt.s32.totalorder %s2090_s8, %s2083_s4 }
  0xd2   : > { %p2087_p7 = pneg %p2086_p11 }
  0xd3   : > { %p2093_p12 = por %p2092_p8, %p2091_p4 }
  0xd5   : > { %p2094_p13 = pnand %p2093_p12, %p2087_p7 }
  0xd7   : > { %2097 = shalt.err (!%p2094_p13)
}
  0xd8   : > { %1801 = dma.hbm_to_vmem [thread:$0]  (!%p2734_p0), %s2481_s13, 16, %s538_s6, %s2397_s30  }
  0xd9   : > { %p2737_p10 = scmp.ne.s32.totalorder %s2717_s24, 0 }
  0xda   : > { %p2738_p5 = scmp.ne.s32.totalorder (!%p2737_p10), %s2716_s23, 0 }
  0xdb   : > { %568 = sbr.rel (%p2737_p10) target bundleno = 938 (0x3aa), region = 72 }
  0xe2   : > { %2123 = dma.done.wait (%p2738_p5), [#allocation4], 128  }
  0xe3   : > { %2125 = vsyncadd (%p2738_p5), [#allocation4], 4294967168 }
  0xe4   : > { %2127 = dma.done.wait (%p2738_p5), [#allocation6], 1040  }
  0xe5   : > { %2129 = vsyncadd (%p2738_p5), [#allocation6], 4294966256 }
  0xe6   : > { %2131 = dma.done.wait (%p2738_p5), [#allocation9], 1152  }
  0xe7   : > { %2133 = vsyncadd (%p2738_p5), [#allocation9], 4294966144  ;;  %s2739_s24 = sadd.s32 4294967295, %s2160_s20   ;;  %s592_s30 = sand.u32 1, %s2144_s16  }
  0xe8   : > { %s590_s26 = sand.u32 1, %s2739_s24   ;;  %s2545_s13 = sshll.u32 %s592_s30, 3 }
  0xe9   : > { %s591_s11 = scalar_lea.sflag [#allocation12], %s590_s26  ;;  %s594_s10 = scalar_lea.vmem [#allocation11], %s2545_s13 }
  0xea   : > { %p2740_p0 = scmp.ne.s32.totalorder %s2725_s28, 0 }
  0xec   : > { %2135 = dma.done.wait (%p2740_p0), %s591_s11, 144  }
  0xed   : > { %2137 = vsyncadd (%p2740_p0), %s591_s11, 4294967152  ;;  %p687_p2 = scmp.lt.s32.totalorder %s2152_s18, 1  ;;  %v2171_v1 = vmov 0.0   ;;  %vm2172_vm0 = vmmov 0   ;;  %s2741_s1 = sld [smem:[#allocation20_spill]]  ;;  %v1870_v2 = vld [vmem:[#allocation3] sm:$0xff]  }
  0xee   : > { %1671 = vmatprep.subr.bf16.mxu1 %v2171_v1  ;;  %1673 = vmatprep.mubr.msk.bf16.mxu1 %vm2172_vm0, %v2171_v1  ;;  %vm748_vm1 = vcmask 130048   ;;  %v1871_v6 = vld [vmem:[#allocation7] sm:$0xff]   ;;  %v1872_v7 = vld [vmem:[#allocation7 + $0x8] sm:$0xff]   ;;  %v1873_v8 = vld [vmem:[#allocation7 + $0x10] sm:$0xff]   ;;  %s2742_s27 = sld [smem:[#allocation26_spill]]  ;;  %s2743_s4 = sld [smem:[#allocation28_spill]] }
  0xef   : > { %s2758_s18 = smov (!%p687_p2, %s2152_s18), 1  ;;  %1703 = vmatprep.subr.bf16.mxu0 %v2171_v1  ;;  %1719 = vmatprep.mubr.msk.bf16.mxu0 %vm2172_vm0, %v2171_v1  ;;  %v1874_v9 = vld [vmem:[#allocation7 + $0x18] sm:$0xff]   ;;  %v1875_v10 = vld [vmem:[#allocation7 + $0x20] sm:$0xff]   ;;  %v1876_v11 = vld [vmem:[#allocation7 + $0x28] sm:$0xff]   ;;  %s2744_s24 = sld [smem:[#allocation23_spill]]  ;;  %vm1074_vm2 = vcmask 7168  }
  0xf0   : > { %s2563_s23 = sshll.u32 %s2758_s18, 4  ;;  %1672 = vmatpush3.bf16.msra.mxu1 %v1870_v2  ;;  %s1632_s12 = sshll.u32 %s2758_s18, 6  ;;  %v1877_v12 = vld [vmem:[#allocation7 + $0x30] sm:$0xff]   ;;  %v1878_v13 = vld [vmem:[#allocation7 + $0x38] sm:$0xff]   ;;  %v1881_v14 = vld [vmem:[#allocation8] sm:$0xff]  }
  0xf1   : > { %1677 = vmatprep.subr.bf16.mxu1 %v2171_v1  ;;  %1704 = vmatpush3.bf16.msra.mxu0 %v1881_v14  ;;  %v1882_v15 = vld [vmem:[#allocation8 + $0x8] sm:$0xff]   ;;  %v1883_v16 = vld [vmem:[#allocation8 + $0x10] sm:$0xff]   ;;  %v1884_v17 = vld [vmem:[#allocation8 + $0x18] sm:$0xff]   ;;  %s1633_s15 = sshll.u32 %s2758_s18, 3  ;;  %s602_s26 = scalar_lea.vmem [#allocation13], %s592_s30 }
  0xf2   : > { %1705 = vmatprep.subr.bf16.mxu0 %v2171_v1  ;;  %v1885_v18 = vld [vmem:[#allocation8 + $0x20] sm:$0xff]   ;;  %v1886_v19 = vld [vmem:[#allocation8 + $0x28] sm:$0xff]   ;;  %v1591_v20 = vld [vmem:[#allocation5] ss:$0 sm:$0xff]  ;;  %s2745_s11 = sld [smem:[#allocation29_spill]]  ;;  %s2747_s5 = sld [smem:[#allocation30_spill]] }
  0xf3   : > { %s694_s14 = scalar_lea.vmem %s2741_s1, %s2563_s23  ;;  %v1879_v29 = vld [vmem:[#allocation10] sm:$0xff]   ;;  %v1880_v31 = vld [vmem:[%s594_s10] sm:$0xff]   ;;  %v1888_v33 = vld [vmem:[#allocation8 + $0x38] sm:$0xff]   ;;  %s2746_s1 = sld [smem:[#allocation27_spill]] }
  0xf4   : > { %v730_v3 = vld [vmem:[%s694_s14] sm:$0xff]  ;;  %v731_v4 = vld [vmem:[%s694_s14 + $0x8] sm:$0xff]  ;;  %s2582_s22 = scalar_lea.vmem %s2742_s27, %s1632_s12  ;;  %s708_s25 = scalar_lea.vmem %s2743_s4, %s1633_s15 }
  0xf5   : > { %v2569_v5 = vpack.c.bf16 %v731_v4, %v730_v3  ;;  %1706 = vmatpush3.bf16.msra.mxu0 %v1882_v15  ;;  %v1887_v32 = vld [vmem:[#allocation8 + $0x30] sm:$0xff]   ;;  %v1890_v48 = vld [vmem:[%s2582_s22 + $0x8] sm:$0xff]   ;;  %v1891_v51 = vld [vmem:[%s2582_s22 + $0x10] sm:$0xff]  }
  0xf6   : > { %1707 = vmatprep.subr.bf16.mxu0 %v2171_v1  ;;  %v1895_v34 = vld [vmem:[%s708_s25] sm:$0xff]   ;;  %v1892_v56 = vld [vmem:[%s2582_s22 + $0x18] sm:$0xff]   ;;  %v1894_v0 = vld [vmem:[%s2582_s22 + $0x28] sm:$0xff]  }
  0xf7   : > { %1674 = vmatmul.mubr.msk.bf16.vlgmr.msra.gmra.mrb[0].mxu1 %vm748_vm1, %v2569_v5  ;;  %v1594_v35 = vld [vmem:[%s2744_s24] ss:$0 sm:$0xff]  ;;  %v1896_v2 = vld [vmem:[%s2582_s22 + $0x30] sm:$0xff]   ;;  %v1897_v3 = vld [vmem:[%s2582_s22 + $0x38] sm:$0xff]  }
  0xf8   : > { %1678 = vmatpush3.bf16.msra.mxu1 %v1871_v6  ;;  %1693 = vmatprep.mubr.msk.bf16.mxu1 %vm2172_vm0, %v2171_v1  ;;  %v1889_v44 = vld [vmem:[%s2582_s22] sm:$0xff]   ;;  %s717_s10 = scalar_lea.vmem %s2745_s11, %s2563_s23  ;;  %s727_s27 = scalar_lea.vmem %s2747_s5, %s2563_s23 }
  0xf9   : > { %1679 = vmatprep.subr.bf16.mxu1 %v2171_v1  ;;  %1708 = vmatpush3.bf16.msra.mxu0 %v1883_v16  ;;  %v1614_v52 = vld [vmem:[%s602_s26] ss:$0 sm:$0xff]  ;;  %s703_s14 = scalar_lea.vmem %s2746_s1, %s2758_s18 }
  0xfa   : > { %1709 = vmatprep.subr.bf16.mxu0 %v2171_v1  ;;  %v1893_v62 = vld [vmem:[%s2582_s22 + $0x20] sm:$0xff]  }
  0xfc   : > { %1680 = vmatpush3.bf16.msra.mxu1 %v1872_v7 }
  0xfd   : > { %1681 = vmatprep.subr.bf16.mxu1 %v2171_v1  ;;  %1710 = vmatpush3.bf16.msra.mxu0 %v1884_v17  ;;  %v1627_v17 = vld [vmem:[%s703_s14] ss:$0 sm:$0xff] }
  0xfe   : > { %1711 = vmatprep.subr.bf16.mxu0 %v2171_v1 }
 0x100   : > { %1682 = vmatpush3.bf16.msra.mxu1 %v1873_v8 }
 0x101   : > { %1683 = vmatprep.subr.bf16.mxu1 %v2171_v1  ;;  %1712 = vmatpush3.bf16.msra.mxu0 %v1885_v18 }
 0x102   : > { %1713 = vmatprep.subr.bf16.mxu0 %v2171_v1 }
 0x104   : > { %1684 = vmatpush3.bf16.msra.mxu1 %v1874_v9  ;;  %v1613_v9 = vld [vmem:[#allocation2] ss:$0 sm:$0xff] }
 0x105   : > { %1685 = vmatprep.subr.bf16.mxu1 %v2171_v1  ;;  %1714 = vmatpush3.bf16.msra.mxu0 %v1886_v19 }
 0x106   : > { %1715 = vmatprep.subr.bf16.mxu0 %v2171_v1 }
 0x108   : > { %1686 = vmatpush3.bf16.msra.mxu1 %v1875_v10 }
 0x109   : > { %1687 = vmatprep.subr.bf16.mxu1 %v2171_v1  ;;  %1716 = vmatpush3.bf16.msra.mxu0 %v1887_v32 }
 0x10a   : > { %1717 = vmatprep.subr.bf16.mxu0 %v2171_v1 }
 0x10c   : > { %1688 = vmatpush3.bf16.msra.mxu1 %v1876_v11 }
 0x10d   : > { %1689 = vmatprep.subr.bf16.mxu1 %v2171_v1  ;;  %1718 = vmatpush3.bf16.msra.mxu0 %v1888_v33 }
 0x10e   : > { %1735 = vmatprep.subr.bf16.mxu0 %v2171_v1 }
 0x110   : > { %1690 = vmatpush3.bf16.msra.mxu1 %v1877_v12 }
 0x111   : > { %1691 = vmatprep.subr.bf16.mxu1 %v2171_v1 }
 0x114   : > { %1692 = vmatpush3.bf16.msra.mxu1 %v1878_v13 }
 0x115   : > { %1697 = vmatprep.subr.bf16.mxu1 %v2171_v1 }
 0x1ca   : > { %v786_v21 = vpop.f32.mrb[0].mxu1 }
 0x1cb   : > { %v787_v22 = vadd.f32 %v1591_v20, %v786_v21  ;;  %v1675_v23 = vpop.f32.mrb[1].mxu1 }
 0x1cc   : > { %v789_v24 = vpop.f32.mrb[2].mxu1 }
 0x1cd   : > { %v790_v25 = vadd.f32 %v1591_v20, %v789_v24  ;;  %v1676_v26 = vpop.f32.mrb[3].mxu1  ;;  %v793_v27 = vmax.f32 %v787_v22, 0.0 }
 0x1cf   : > { %v794_v28 = vmax.f32 %v790_v25, 0.0 }
 0x1d1   : > { %v795_v30 = vpack.c.bf16 %v794_v28, %v793_v27 }
 0x1d3   : > { %1694 = vmatmul.mubr.bf16.vlgmr.msra.gmra.mrb[4].mxu1 %v795_v30 }
 0x1d4   : > { %1698 = vmatpush3.bf16.msra.mxu1 %v1879_v29  ;;  %1699 = vmatprep.mubr.msk.bf16.mxu1 %vm2172_vm0, %v2171_v1 }
 0x1d5   : > { %1723 = vmatprep.subr.bf16.mxu1 %v2171_v1 }
 0x1db   : > { %1700 = vmatmul.mubr.msk.bf16.vlgmr.msra.gmra.mrb[8].mxu1 %vm748_vm1, %v2569_v5 }
 0x1dc   : > { %1724 = vmatpush3.bf16.msra.mxu1 %v1880_v31  ;;  %1725 = vmatprep.mubr.msk.bf16.mxu1 %vm2172_vm0, %v2171_v1 }
 0x1dd   : > { %1729 = vmatprep.subr.bf16.mxu1 %v2171_v1 }
 0x1e3   : > { %1726 = vmatmul.mubr.msk.bf16.vlgmr.msra.gmra.mrb[12].mxu1 %vm748_vm1, %v2569_v5 }
 0x1e4   : > { %1731 = vmatprep.mubr.msk.bf16.mxu1 %vm2172_vm0, %v2171_v1  ;;  %1730 = vmatpush3.bf16.msra.mxu1 %v1895_v34 }
 0x1eb   : > { %1732 = vmatmul.mubr.msk.bf16.vlgmr.msra.gmra.mrb[16].mxu1 %vm748_vm1, %v2569_v5 }
 0x2a6   : > { %v901_v36 = vpop.f32.mrb[4].mxu1 }
 0x2a7   : > { %v902_v37 = vadd.f32 %v1594_v35, %v901_v36  ;;  %v1695_v38 = vpop.f32.mrb[5].mxu1 }
 0x2a8   : > { %v904_v39 = vpop.f32.mrb[6].mxu1 }
 0x2a9   : > { %v905_v40 = vadd.f32 %v1594_v35, %v904_v39  ;;  %v1696_v41 = vpop.f32.mrb[7].mxu1  ;;  %v908_v42 = vmax.f32 %v902_v37, 0.0 }
 0x2ab   : > { %v909_v43 = vmax.f32 %v905_v40, 0.0 }
 0x2ad   : > { %v910_v45 = vpack.c.bf16 %v909_v43, %v908_v42 }
 0x2ae   : > { %v969_v46 = vpop.f32.mrb[8].mxu1 }
 0x2af   : > { %1720 = vmatmul.mubr.bf16.vlgmr.msra.gmra.mrb[0].mxu0 %v910_v45  ;;  %v1701_v47 = vpop.f32.mrb[9].mxu1 }
 0x2b0   : > { %1736 = vmatpush3.bf16.msra.mxu0 %v1889_v44  ;;  %v972_v49 = vpop.f32.mrb[10].mxu1  ;;  %1751 = vmatprep.mubr.msk.bf16.mxu0 %vm2172_vm0, %v2171_v1 }
 0x2b1   : > { %1737 = vmatprep.subr.bf16.mxu0 %v2171_v1  ;;  %v1702_v50 = vpop.f32.mrb[11].mxu1 }
 0x2b4   : > { %1738 = vmatpush3.bf16.msra.mxu0 %v1890_v48 }
 0x2b5   : > { %1739 = vmatprep.subr.bf16.mxu0 %v2171_v1 }
 0x2b6   : > { %v1126_v53 = vpop.f32.mrb[12].mxu1 }
 0x2b7   : > { %v1127_v54 = vadd.f32 %v1614_v52, %v1126_v53  ;;  %v1727_v55 = vpop.f32.mrb[13].mxu1 }
 0x2b8   : > { %1740 = vmatpush3.bf16.msra.mxu0 %v1891_v51  ;;  %v1129_v57 = vpop.f32.mrb[14].mxu1 }
 0x2b9   : > { %1741 = vmatprep.subr.bf16.mxu0 %v2171_v1  ;;  %v1133_v58 = vmax.f32 %v1127_v54, 0.0  ;;  %v1130_v59 = vadd.f32 %v1614_v52, %v1129_v57  ;;  %v1728_v60 = vpop.f32.mrb[15].mxu1 }
 0x2bb   : > { %v1134_v61 = vmax.f32 %v1130_v59, 0.0 }
 0x2bc   : > { %1742 = vmatpush3.bf16.msra.mxu0 %v1892_v56 }
 0x2bd   : > { %1743 = vmatprep.subr.bf16.mxu0 %v2171_v1  ;;  %v1135_v63 = vpack.c.bf16 %v1134_v61, %v1133_v58 }
 0x2be   : > { %v1194_v4 = vpop.f32.mrb[16].mxu1 }
 0x2bf   : > { %v1733_v5 = vpop.f32.mrb[17].mxu1 }
 0x2c0   : > { %1744 = vmatpush3.bf16.msra.mxu0 %v1893_v62  ;;  %v1197_v6 = vpop.f32.mrb[18].mxu1 }
 0x2c1   : > { %1745 = vmatprep.subr.bf16.mxu0 %v2171_v1  ;;  %v1734_v7 = vpop.f32.mrb[19].mxu1 }
 0x2c4   : > { %1746 = vmatpush3.bf16.msra.mxu0 %v1894_v0 }
 0x2c5   : > { %1747 = vmatprep.subr.bf16.mxu0 %v2171_v1 }
 0x2c8   : > { %1748 = vmatpush3.bf16.msra.mxu0 %v1896_v2 }
 0x2c9   : > { %1749 = vmatprep.subr.bf16.mxu0 %v2171_v1 }
 0x2cc   : > { %1750 = vmatpush3.bf16.msra.mxu0 %v1897_v3 }
 0x2cf   : > { %1752 = vmatmul.mubr.bf16.vlgmr.msra.gmra.mrb[4].mxu0 %v1135_v63 }
 0x382   : > { %v1058_v8 = vpop.f32.mrb[0].mxu0 }
 0x383   : > { %v1059_v10 = vadd.f32 %v1058_v8, %v969_v46  ;;  %v1721_v11 = vpop.f32.mrb[1].mxu0 }
 0x384   : > { %v1061_v12 = vpop.f32.mrb[2].mxu0 }
 0x385   : > { %v1072_v13 = vadd.f32 %v1613_v9, %v1059_v10  ;;  %v1062_v1 = vadd.f32 %v1061_v12, %v972_v49  ;;  %v1722_v14 = vpop.f32.mrb[3].mxu0 }
 0x387   : > { %1075 = vst.msk [vmem:[%s717_s10] sm:$0xff] %vm1074_vm2, %v1072_v13  ;;  %v1073_v15 = vadd.f32 %v1613_v9, %v1062_v1 }
 0x389   : > { %1076 = vst.msk [vmem:[%s717_s10 + $0x8] sm:$0xff] %vm1074_vm2, %v1073_v15 }
 0x3a2   : > { %v1283_v16 = vpop.f32.mrb[4].mxu0 }
 0x3a3   : > { %v1284_v18 = vadd.f32 %v1283_v16, %v1194_v4  ;;  %v1753_v19 = vpop.f32.mrb[5].mxu0 }
 0x3a4   : > { %v1286_v20 = vpop.f32.mrb[6].mxu0 }
 0x3a5   : > { %v1297_v21 = vadd.f32 %v1627_v17, %v1284_v18  ;;  %v1287_v22 = vadd.f32 %v1286_v20, %v1197_v6  ;;  %v1754_v23 = vpop.f32.mrb[7].mxu0 }
 0x3a7   : > { %1299 = vst.msk [vmem:[%s727_s27] sm:$0xff] %vm1074_vm2, %v1297_v21  ;;  %v1298_v24 = vadd.f32 %v1627_v17, %v1287_v22 }
 0x3a9   : > { %1300 = vst.msk [vmem:[%s727_s27 + $0x8] sm:$0xff] %vm1074_vm2, %v1298_v24 }
 0x3aa PF: > { %s33_s20 = sadd.s32 1, %s2160_s20   ;;  %s2748_s18 = sld [smem:[#allocation19_spill]] }
 0x3ab   : > { %p30_p6 = scmp.ge.s32.totalorder %s33_s20, 4   ;;  %s2749_s22 = sld [smem:[#allocation18_spill]] }
 0x3ac   : > { %s2750_s15 = smov %s2144_s16  ;;  %s2751_s16 = smov %s2148_s17 }
 0x3ad   :  { %32 = sbr.rel (!%p30_p6) target bundleno = 19 (0x13), region = 168 }
 0x3b0   : > { %s2752_s17 = smov %s2748_s18  ;;  %s2753_s18 = smov %s2156_s19 }
 0x3b1   : > { %s2754_s19 = smov %s2749_s22 }
 0x3b4   :  { %1356 = vsyncpa [#allocation4], 1 }
 0x3b5   :  { %1358 = vsyncpa [#allocation4 + $0x1], 1 }
 0x3b6   :  { %1359 = vsyncpa [#allocation6], 1 }
 0x3b7   :  { %1360 = vsyncpa [#allocation9], 1 }
 0x3b8   :  { %1361 = vsyncpa [#allocation12], 1 }
 0x3b9   :  { %1363 = vsyncpa [#allocation12 + $0x1], 1 }

</bundles_post_ra>
